<compile_context>
chip_gen: v6e
topology: v6e:2x2x1
jax: 0.10.0
libtpu: 0.0.40
codegen_flags: <defaults>
</compile_context>

<pallas_src>
import jax
import jax.numpy as jnp
from jax.experimental import pallas as pl
from jax.experimental.pallas import tpu as pltpu

# ----------------------------- problem sizes -----------------------------
B = 2             # batch
C = 4             # input channels
H = W = 16        # spatial
HW = H * W
FEAT = 32         # hidden features
NUM_CLASSES = 16  # small character alphabet


# ------------------------------ Pallas kernel -----------------------------
def ocr_head_kernel(x_ref, w1_ref, b1_ref, w2_ref, b2_ref, o_ref):
    """Fused OCR head:
       1x1 conv (channel contraction) -> +bias -> ReLU ->
       global average pool over H*W -> linear classifier -> logits.

    Layouts (all f32):
      x_ref : (B, C, HW)      NCHW with spatial dims flattened (lane axis = HW)
      w1_ref: (C, FEAT, 1)    per-channel column, broadcasts over (FEAT, HW)
      b1_ref: (1, FEAT, 1)
      w2_ref: (FEAT, NCLS)    already scaled by 1/HW (pool scale folded in)
      b2_ref: (1, NCLS)
      o_ref : (B, NCLS)
    """
    x = x_ref[...]                                   # (B, C, HW)
    w1 = w1_ref[...]                                 # (C, F, 1)
    n_chan = x.shape[1]

    # 1x1 conv over channels, unrolled on the VPU: a K=4 contraction would
    # leave the MXU ~99% idle while paying full fill/drain latency, so do it
    # as 4 broadcast multiply-adds on lane-dense (B, FEAT, HW) data.
    h = x[:, 0:1, :] * w1[0:1]                       # (B, F, HW)
    for ci in range(1, n_chan):                      # static unroll, C-1 iters
        h = h + x[:, ci:ci + 1, :] * w1[ci:ci + 1]

    # bias + ReLU on the VPU (single bias load, implicit broadcast)
    h = jnp.maximum(h + b1_ref[...], 0.0)            # (B, F, HW)

    # global average pool over HW: cross-lane sum on the (idle) XLU; the
    # 1/HW scale is already folded into w2 by the parameter prep.
    pooled = jnp.sum(h, axis=-1)                     # (B, F)

    # classifier head (tiny MXU matmul, f32 accumulation)
    logits = jnp.dot(pooled, w2_ref[...],
                     preferred_element_type=jnp.float32) + b2_ref[...]
    o_ref[...] = logits.astype(o_ref.dtype)


# ------------------------------ host wrapper -------------------------------
def _make_ocr_head_call(batch, nclasses):
    vmem = pl.BlockSpec(memory_space=pltpu.MemorySpace.VMEM)
    # No grid: the whole problem (a few KiB) is a single VMEM-resident
    # invocation; a grid here would only add per-step overhead.
    # TODO(synk): when the real OCR module (realistic H, W, C, FEAT) is
    # plugged in, add a grid over B / HW tiles with
    # dimension_semantics=("parallel", ...) so v7x's two TensorCores are used,
    # and size tiles for v7x's 64 MiB VMEM (raise vmem_limit_bytes if needed).
    return pl.pallas_call(
        ocr_head_kernel,
        out_shape=jax.ShapeDtypeStruct((batch, nclasses), jnp.float32),
        in_specs=[vmem, vmem, vmem, vmem, vmem],
        out_specs=vmem,
    )


@jax.jit
def ocr_head_forward(x_nchw, w1_k, b1_k, w2_k, b2_k):
    """Per-call work: one free reshape (no transpose, no extra HBM pass)
    plus one fused pallas_call."""
    b, c, h, w = x_nchw.shape
    x_bcn = x_nchw.reshape(b, c, h * w)              # NCHW -> (B, C, HW): free
    call = _make_ocr_head_call(b, w2_k.shape[1])
    return call(x_bcn, w1_k, b1_k, w2_k, b2_k)


# ---------------------------- module equivalents ---------------------------
class InnerOCRModule:
    """Deterministic stand-in for the (unspecified) inner OCR module.

    Parameters are pre-shaped / pre-scaled ONCE for the kernel layout:
      w1_k = w1.reshape(C, FEAT, 1)   (broadcasts over (FEAT, HW) tiles)
      b1_k = b1.reshape(1, FEAT, 1)
      w2_k = w2 / (H*W)               (average-pool scale folded in)
      b2_k = b2.reshape(1, NUM_CLASSES)
    """

    def __init__(self, key):
        k1, k2, k3, k4 = jax.random.split(key, 4)
        w1 = jax.random.normal(k1, (C, FEAT), jnp.float32) * 0.1
        b1 = jax.random.normal(k2, (FEAT,), jnp.float32) * 0.01
        w2 = jax.random.normal(k3, (FEAT, NUM_CLASSES), jnp.float32) * 0.1
        b2 = jax.random.normal(k4, (NUM_CLASSES,), jnp.float32) * 0.01
        self.w1_k = w1.reshape(C, FEAT, 1)
        self.b1_k = b1.reshape(1, FEAT, 1)
        self.w2_k = w2 * (1.0 / HW)
        self.b2_k = b2.reshape(1, NUM_CLASSES)

    def __call__(self, x, y, is_train=False):
        logits = ocr_head_forward(x, self.w1_k, self.b1_k, self.w2_k, self.b2_k)
        if is_train:
            # TODO(synk): training-time loss of the original (unspecified)
            # inner OCR module is unknown; only the inference path is done.
            pass
        return logits


class WrappedModel:
    """convert DataParallel to cpu — pure delegation wrapper (exact semantics)."""

    def __init__(self, module):
        self.module = module

    def forward(self, x, y, is_train=False):
        return self.module(x, y, is_train=is_train)

    __call__ = forward


# ---------------------------------- main -----------------------------------
if __name__ == "__main__":
    key = jax.random.PRNGKey(0)
    k_params, k_x, k_y = jax.random.split(key, 3)

    model = WrappedModel(InnerOCRModule(k_params))

    x = jax.random.normal(k_x, (B, C, H, W), jnp.float32)          # NCHW, like PyTorch
    y = jax.random.randint(k_y, (B,), 0, NUM_CLASSES, jnp.int32)   # labels (unused in eval)

    out = model(x, y, is_train=False)
    out = jax.block_until_ready(out)

    assert out.shape == (B, NUM_CLASSES) and out.dtype == jnp.float32

    # pure-JAX reference (same math, plain XLA ops) for a correctness check
    w1_ref = model.module.w1_k[:, :, 0]                            # (C, F)
    b1_ref = model.module.b1_k[0, :, 0]                            # (F,)
    h_ref = jnp.einsum("bchw,cf->bfhw", x, w1_ref) + b1_ref[None, :, None, None]
    h_ref = jnp.maximum(h_ref, 0.0)
    pooled_ref = h_ref.reshape(B, FEAT, HW).sum(axis=-1)           # sum; 1/HW is in w2_k
    ref = pooled_ref @ model.module.w2_k + model.module.b2_k
    assert bool(jnp.allclose(out, ref, atol=1e-4, rtol=1e-4)), "mismatch vs reference"

    print("KERNEL_OK")
</pallas_src>

<mosaic_0001>
module attributes {stable_mosaic.version = 11 : i64} {
  func.func @ocr_head_kernel(%arg0: memref<2x4x256xf32, #tpu.memory_space<vmem>>, %arg1: memref<4x32x1xf32, #tpu.memory_space<vmem>>, %arg2: memref<1x32x1xf32, #tpu.memory_space<vmem>>, %arg3: memref<32x16xf32, #tpu.memory_space<vmem>>, %arg4: memref<1x16xf32, #tpu.memory_space<vmem>>, %arg5: memref<2x16xf32, #tpu.memory_space<vmem>>) attributes {dimension_semantics = [], scalar_prefetch = 0 : i64, scratch_operands = 0 : i64, tpu.core_type = #tpu.core_type<tc>} {
    %c0 = arith.constant 0 : index
    %c0_0 = arith.constant 0 : index
    %c0_1 = arith.constant 0 : index
    %0 = vector.load %arg0[%c0, %c0_0, %c0_1] : memref<2x4x256xf32, #tpu.memory_space<vmem>>, vector<2x4x256xf32>
    %c0_2 = arith.constant 0 : index
    %c0_3 = arith.constant 0 : index
    %c0_4 = arith.constant 0 : index
    %1 = vector.load %arg1[%c0_2, %c0_3, %c0_4] : memref<4x32x1xf32, #tpu.memory_space<vmem>>, vector<4x32x1xf32>
    %2 = vector.extract_strided_slice %0 {offsets = [0, 0, 0], sizes = [2, 1, 256], strides = [1, 1, 1]} : vector<2x4x256xf32> to vector<2x1x256xf32>
    %3 = vector.extract_strided_slice %1 {offsets = [0, 0, 0], sizes = [1, 32, 1], strides = [1, 1, 1]} : vector<4x32x1xf32> to vector<1x32x1xf32>
    %4 = vector.broadcast %2 : vector<2x1x256xf32> to vector<2x32x256xf32>
    %5 = vector.broadcast %3 : vector<1x32x1xf32> to vector<2x32x256xf32>
    %6 = arith.mulf %4, %5 : vector<2x32x256xf32>
    %7 = vector.extract_strided_slice %0 {offsets = [0, 1, 0], sizes = [2, 1, 256], strides = [1, 1, 1]} : vector<2x4x256xf32> to vector<2x1x256xf32>
    %8 = vector.extract_strided_slice %1 {offsets = [1, 0, 0], sizes = [1, 32, 1], strides = [1, 1, 1]} : vector<4x32x1xf32> to vector<1x32x1xf32>
    %9 = vector.broadcast %7 : vector<2x1x256xf32> to vector<2x32x256xf32>
    %10 = vector.broadcast %8 : vector<1x32x1xf32> to vector<2x32x256xf32>
    %11 = arith.mulf %9, %10 : vector<2x32x256xf32>
    %12 = arith.addf %6, %11 : vector<2x32x256xf32>
    %13 = vector.extract_strided_slice %0 {offsets = [0, 2, 0], sizes = [2, 1, 256], strides = [1, 1, 1]} : vector<2x4x256xf32> to vector<2x1x256xf32>
    %14 = vector.extract_strided_slice %1 {offsets = [2, 0, 0], sizes = [1, 32, 1], strides = [1, 1, 1]} : vector<4x32x1xf32> to vector<1x32x1xf32>
    %15 = vector.broadcast %13 : vector<2x1x256xf32> to vector<2x32x256xf32>
    %16 = vector.broadcast %14 : vector<1x32x1xf32> to vector<2x32x256xf32>
    %17 = arith.mulf %15, %16 : vector<2x32x256xf32>
    %18 = arith.addf %12, %17 : vector<2x32x256xf32>
    %19 = vector.extract_strided_slice %0 {offsets = [0, 3, 0], sizes = [2, 1, 256], strides = [1, 1, 1]} : vector<2x4x256xf32> to vector<2x1x256xf32>
    %20 = vector.extract_strided_slice %1 {offsets = [3, 0, 0], sizes = [1, 32, 1], strides = [1, 1, 1]} : vector<4x32x1xf32> to vector<1x32x1xf32>
    %21 = vector.broadcast %19 : vector<2x1x256xf32> to vector<2x32x256xf32>
    %22 = vector.broadcast %20 : vector<1x32x1xf32> to vector<2x32x256xf32>
    %23 = arith.mulf %21, %22 : vector<2x32x256xf32>
    %24 = arith.addf %18, %23 : vector<2x32x256xf32>
    %c0_5 = arith.constant 0 : index
    %c0_6 = arith.constant 0 : index
    %c0_7 = arith.constant 0 : index
    %25 = vector.load %arg2[%c0_5, %c0_6, %c0_7] : memref<1x32x1xf32, #tpu.memory_space<vmem>>, vector<1x32x1xf32>
    %26 = vector.broadcast %25 : vector<1x32x1xf32> to vector<2x32x256xf32>
    %27 = arith.addf %24, %26 : vector<2x32x256xf32>
    %cst = arith.constant 0.000000e+00 : f32
    %28 = vector.broadcast %cst : f32 to vector<2x32x256xf32>
    %29 = arith.maximumf %27, %28 : vector<2x32x256xf32>
    %cst_8 = arith.constant dense<0.000000e+00> : vector<2x32xf32>
    %30 = vector.multi_reduction <add>, %29, %cst_8 [2] : vector<2x32x256xf32> to vector<2x32xf32>
    %c0_9 = arith.constant 0 : index
    %c0_10 = arith.constant 0 : index
    %31 = vector.load %arg3[%c0_9, %c0_10] : memref<32x16xf32, #tpu.memory_space<vmem>>, vector<32x16xf32>
    %cst_11 = arith.constant dense<0.000000e+00> : vector<2x16xf32>
    %32 = tpu.matmul %30, %31, %cst_11 {dimension_numbers = #tpu.dot_dimension_numbers<[1], [0], [0], [1], [0, 0, 1, 1], [], []>} : vector<2x32xf32>, vector<32x16xf32>, vector<2x16xf32> -> vector<2x16xf32>
    %c0_12 = arith.constant 0 : index
    %c0_13 = arith.constant 0 : index
    %33 = vector.load %arg4[%c0_12, %c0_13] : memref<1x16xf32, #tpu.memory_space<vmem>>, vector<1x16xf32>
    %34 = vector.broadcast %33 : vector<1x16xf32> to vector<2x16xf32>
    %35 = arith.addf %32, %34 : vector<2x16xf32>
    %c0_14 = arith.constant 0 : index
    %c0_15 = arith.constant 0 : index
    %36 = vector.load %arg5[%c0_14, %c0_15] : memref<2x16xf32, #tpu.memory_space<vmem>>, vector<2x16xf32>
    tpu.vector_store %arg5[%c0_14, %c0_15], %35 {strides = array<i32>} : memref<2x16xf32, #tpu.memory_space<vmem>>, vector<2x16xf32>,
    return
  }
}

</mosaic_0001>

<bundles_post_ra>
// kernel: ocr_head_forward.1
= control target key start
LH: loop header
LB: loop body
LE: loop exit
PB: predicated region body
PF: predicated region fallthrough
CT: control target
= control target key end

     0   :  { %v659_v2 = vmov 0   ;;  %s847_s0 = inlined_call_operand.vmem [shape: f32[2,4,256], index: 0, kind: input, shape index: {}]   ;;  %s848_s1 = inlined_call_operand.vmem [shape: f32[4,32,1], index: 1, kind: input, shape index: {}]   ;;  %s849_s2 = inlined_call_operand.vmem [shape: f32[1,32,1], index: 2, kind: input, shape index: {}]   ;;  %s850_s3 = inlined_call_operand.vmem [shape: f32[32,16], index: 3, kind: input, shape index: {}]   ;;  %s851_s4 = inlined_call_operand.vmem [shape: f32[1,16], index: 4, kind: input, shape index: {}]   ;;  %s852_s5 = inlined_call_operand.hbm [shape: f32[2,16], index: 5, kind: output, shape index: {}]  }
   0x1   :  { %v27_v0 = vld [vmem:[%s848_s1 + $0x20] sm:$0xff]  ;;  %636 = vset.pattern.permute.xlu1 %v659_v2  ;;  %635 = vset.pattern.permute.xlu0 %v659_v2  ;;  %v28_v3 = vld [vmem:[%s848_s1 + $0x28] sm:$0xff]  ;;  %v29_v5 = vld [vmem:[%s848_s1 + $0x30] sm:$0xff] }
   0x2   :  { %v23_v1 = vld [vmem:[%s848_s1] sm:$0xff]  ;;  %151 = vperm.xlu1 %636, %v27_v0   ;;  %v24_v4 = vld [vmem:[%s848_s1 + $0x8] sm:$0xff]  ;;  %v25_v6 = vld [vmem:[%s848_s1 + $0x10] sm:$0xff] }
   0x3   :  { %79 = vperm.xlu0 %635, %v23_v1  }
   0x6   :  { %156 = vperm.xlu1 %636, %v28_v3  }
   0x7   :  { %84 = vperm.xlu0 %635, %v24_v4  }
   0x8   :  { %10 = vsyncpa [#allocation3], 0  ;;  %v30_v7 = vld [vmem:[%s848_s1 + $0x38] sm:$0xff]  ;;  %v32_v9 = vld [vmem:[%s848_s1 + $0x48] sm:$0xff]  ;;  %v41_v21 = vlaneseq  ;;  %vm661_vm0 = vmmov 0   ;;  %vm487_vm1 = vcmask 130112  }
   0x9   :  { %v26_v8 = vld [vmem:[%s848_s1 + $0x18] sm:$0xff]  ;;  %v31_v10 = vld [vmem:[%s848_s1 + $0x40] sm:$0xff]  ;;  %v33_v12 = vld [vmem:[%s848_s1 + $0x50] sm:$0xff]  ;;  %vm494_vm2 = vcmask 195712   ;;  %vm501_vm3 = vcmask 261312   ;;  %vm522_vm4 = vcmask 1041409  }
   0xa   :  { %161 = vperm.xlu1 %636, %v29_v5   ;;  %v34_v11 = vld [vmem:[%s848_s1 + $0x58] sm:$0xff]  ;;  %v36_v13 = vld [vmem:[%s848_s1 + $0x68] sm:$0xff]  ;;  %v35_v14 = vld [vmem:[%s848_s1 + $0x60] sm:$0xff]  ;;  %v754_v22 = vshrl.u32 %v41_v21, 7  ;;  %vm524_vm5 = vcmask 261120   ;;  %s662_s18 = smov [#allocation2]  }
   0xb   :  { %89 = vperm.xlu0 %635, %v25_v6   ;;  %v38_v15 = vld [vmem:[%s848_s1 + $0x78] sm:$0xff]  ;;  %v37_v16 = vld [vmem:[%s848_s1 + $0x70] sm:$0xff]  ;;  %v378_v17 = vld [vmem:[%s849_s2 + $0x8] sm:$0xff]  ;;  %s605_s19 = sshll.u32 %s662_s18, 4  ;;  %vm597_vm6 = vcmask 123904   ;;  %s606_s19 = int_to_ptr.vmem [resolvable:$true] %s605_s19 }
   0xc   :  { %v377_v18 = vld [vmem:[%s849_s2] sm:$0xff]  ;;  %v380_v19 = vld [vmem:[%s849_s2 + $0x18] sm:$0xff]  ;;  %v379_v20 = vld [vmem:[%s849_s2 + $0x10] sm:$0xff]  ;;  %v115_v23 = vsub.s32 1, %v754_v22  ;;  %v119_v24 = vsub.s32 5, %v754_v22  ;;  %v43_v27 = vsub.s32 0, %v754_v22  ;;  %p642_p1 = scmp.lt.s32.totalorder %s606_s19, %s606_s19 }
   0xd   :  { %v21_v25 = vld [vmem:[%s847_s0] sm:$0xff]  ;;  %v22_v26 = vld [vmem:[%s847_s0 + $0x8] sm:$0xff]  ;;  %v47_v28 = vsub.s32 4, %v754_v22  ;;  %v203_v37 = vsub.s32 2, %v754_v22  ;;  %v207_v38 = vsub.s32 6, %v754_v22  ;;  %v291_v41 = vsub.s32 3, %v754_v22 }
   0xe   :  { %166 = vperm.xlu1 %636, %v30_v7   ;;  %v116_v29 = vrot.slane %v21_v25, %v115_v23  ;;  %v120_v30 = vrot.slane %v21_v25, %v119_v24  ;;  %v124_v31 = vrot.slane %v22_v26, %v115_v23  ;;  %v128_v32 = vrot.slane %v22_v26, %v119_v24  ;;  %s637_s20 = scalar_lea.vmem %s606_s19, 32 }
   0xf   :  { %94 = vperm.xlu0 %635, %v26_v8   ;;  %v44_v33 = vrot.slane %v21_v25, %v43_v27  ;;  %v48_v34 = vrot.slane %v21_v25, %v47_v28  ;;  %v52_v35 = vrot.slane %v22_v26, %v43_v27  ;;  %v56_v36 = vrot.slane %v22_v26, %v47_v28  ;;  %p638_p0 = scmp.ne.s32.totalorder %s606_s19, %s637_s20  ;;  %p643_p2 = scmp.lt.s32.totalorder %s637_s20, %s637_s20 }
  0x10   :  { %v295_v42 = vsub.s32 7, %v754_v22  ;;  %v136_v43 = vrot.slane %v116_v29, %v115_v23  ;;  %v140_v44 = vrot.slane %v120_v30, %v115_v23  ;;  %v144_v45 = vrot.slane %v124_v31, %v115_v23 }
  0x11   :  { %v148_v46 = vrot.slane %v128_v32, %v115_v23  ;;  %v64_v47 = vrot.slane %v44_v33, %v43_v27  ;;  %v68_v48 = vrot.slane %v48_v34, %v43_v27  ;;  %v72_v49 = vrot.slane %v52_v35, %v43_v27  ;;  %p644_p3 = por %p643_p2, %p642_p1 }
  0x12   :  { %244 = vperm.xlu1 %636, %v32_v9   ;;  %v76_v50 = vrot.slane %v56_v36, %v43_v27  ;;  %v204_v51 = vrot.slane %v21_v25, %v203_v37  ;;  %v208_v52 = vrot.slane %v21_v25, %v207_v38  ;;  %v212_v53 = vrot.slane %v22_v26, %v203_v37 }
  0x13   :  { %239 = vperm.xlu0 %635, %v31_v10   ;;  %v216_v54 = vrot.slane %v22_v26, %v207_v38  ;;  %v292_v57 = vrot.slane %v21_v25, %v291_v41  ;;  %v296_v58 = vrot.slane %v21_v25, %v295_v42  ;;  %v300_v59 = vrot.slane %v22_v26, %v291_v41  ;;  %p645_p4 = pnand %p644_p3, %p638_p0 }
  0x14   :  { %v304_v60 = vrot.slane %v22_v26, %v295_v42 }
  0x15   :  { %v782_v23 = vrot.slane %v300_v59, %v291_v41 }
  0x16   :  { %254 = vperm.xlu1 %636, %v34_v11   ;;  %v784_v24 = vrot.slane %v304_v60, %v291_v41 }
  0x17   :  { %249 = vperm.xlu0 %635, %v33_v12  }
  0x1a   :  { %332 = vperm.xlu1 %636, %v36_v13  }
  0x1b   :  { %327 = vperm.xlu0 %635, %v35_v14  }
  0x1e   :  { %342 = vperm.xlu1 %636, %v38_v15   ;;  %v770_v15 = vrot.slane %v204_v51, %v203_v37 }
  0x1f   :  { %337 = vperm.xlu0 %635, %v37_v16   ;;  %v772_v16 = vrot.slane %v208_v52, %v203_v37 }
  0x22   :  { %388 = vperm.xlu1 %636, %v378_v17   ;;  %v774_v17 = vrot.slane %v212_v53, %v203_v37 }
  0x23   :  { %383 = vperm.xlu0 %635, %v377_v18   ;;  %v776_v18 = vrot.slane %v216_v54, %v203_v37 }
  0x26   :  { %398 = vperm.xlu1 %636, %v380_v19   ;;  %v778_v19 = vrot.slane %v292_v57, %v291_v41 }
  0x27   :  { %393 = vperm.xlu0 %635, %v379_v20   ;;  %v780_v20 = vrot.slane %v296_v58, %v291_v41 }
  0x7d   :  { %v152_v39 = vpop.permute.xlu1 %151 }
  0x7e   :  { %v80_v40 = vpop.permute.xlu0 %79  ;;  %v169_v61 = vmul.f32 %v152_v39, %v136_v43  ;;  %v170_v62 = vmul.f32 %v152_v39, %v140_v44  ;;  %v177_v63 = vmul.f32 %v152_v39, %v144_v45  ;;  %v178_v0 = vmul.f32 %v152_v39, %v148_v46 }
  0x7f   :  { %v97_v1 = vmul.f32 %v80_v40, %v64_v47  ;;  %v98_v2 = vmul.f32 %v80_v40, %v68_v48  ;;  %v105_v3 = vmul.f32 %v80_v40, %v72_v49  ;;  %v106_v4 = vmul.f32 %v80_v40, %v76_v50 }
  0x81   :  { %v157_v55 = vpop.permute.xlu1 %156  ;;  %v185_v25 = vadd.f32 %v169_v61, %v97_v1  ;;  %v186_v26 = vadd.f32 %v170_v62, %v98_v2  ;;  %v193_v27 = vadd.f32 %v177_v63, %v105_v3  ;;  %v194_v28 = vadd.f32 %v178_v0, %v106_v4 }
  0x82   :  { %v85_v56 = vpop.permute.xlu0 %84  ;;  %v171_v5 = vmul.f32 %v157_v55, %v136_v43  ;;  %v172_v6 = vmul.f32 %v157_v55, %v140_v44  ;;  %v179_v7 = vmul.f32 %v157_v55, %v144_v45  ;;  %v180_v8 = vmul.f32 %v157_v55, %v148_v46 }
  0x83   :  { %v99_v9 = vmul.f32 %v85_v56, %v64_v47  ;;  %v100_v10 = vmul.f32 %v85_v56, %v68_v48  ;;  %v107_v11 = vmul.f32 %v85_v56, %v72_v49  ;;  %v108_v12 = vmul.f32 %v85_v56, %v76_v50 }
  0x85   :  { %v162_v13 = vpop.permute.xlu1 %161  ;;  %v187_v29 = vadd.f32 %v171_v5, %v99_v9  ;;  %v188_v30 = vadd.f32 %v172_v6, %v100_v10  ;;  %v195_v31 = vadd.f32 %v179_v7, %v107_v11  ;;  %v196_v32 = vadd.f32 %v180_v8, %v108_v12 }
  0x86   :  { %v90_v14 = vpop.permute.xlu0 %89  ;;  %v173_v35 = vmul.f32 %v162_v13, %v136_v43  ;;  %v174_v36 = vmul.f32 %v162_v13, %v140_v44  ;;  %v181_v39 = vmul.f32 %v162_v13, %v144_v45  ;;  %v182_v40 = vmul.f32 %v162_v13, %v148_v46 }
  0x87   :  { %v101_v37 = vmul.f32 %v90_v14, %v64_v47  ;;  %v102_v38 = vmul.f32 %v90_v14, %v68_v48  ;;  %v109_v42 = vmul.f32 %v90_v14, %v72_v49  ;;  %v110_v51 = vmul.f32 %v90_v14, %v76_v50 }
  0x89   :  { %v167_v33 = vpop.permute.xlu1 %166  ;;  %v189_v61 = vadd.f32 %v173_v35, %v101_v37  ;;  %v190_v62 = vadd.f32 %v174_v36, %v102_v38  ;;  %v197_v1 = vadd.f32 %v181_v39, %v109_v42  ;;  %v198_v2 = vadd.f32 %v182_v40, %v110_v51 }
  0x8a   :  { %v95_v34 = vpop.permute.xlu0 %94  ;;  %v175_v41 = vmul.f32 %v167_v33, %v136_v43  ;;  %v176_v52 = vmul.f32 %v167_v33, %v140_v44  ;;  %v183_v53 = vmul.f32 %v167_v33, %v144_v45  ;;  %v184_v54 = vmul.f32 %v167_v33, %v148_v46 }
  0x8b   :  { %v103_v55 = vmul.f32 %v95_v34, %v64_v47  ;;  %v104_v56 = vmul.f32 %v95_v34, %v68_v48  ;;  %v111_v57 = vmul.f32 %v95_v34, %v72_v49  ;;  %v112_v58 = vmul.f32 %v95_v34, %v76_v50 }
  0x8d   :  { %v245_v59 = vpop.permute.xlu1 %244  ;;  %v191_v48 = vadd.f32 %v175_v41, %v103_v55  ;;  %v192_v49 = vadd.f32 %v176_v52, %v104_v56  ;;  %v199_v50 = vadd.f32 %v183_v53, %v111_v57  ;;  %v200_v4 = vadd.f32 %v184_v54, %v112_v58 }
  0x8e   :  { %v240_v60 = vpop.permute.xlu0 %239  ;;  %v259_v63 = vmul.f32 %v245_v59, %v770_v15  ;;  %v260_v0 = vmul.f32 %v245_v59, %v772_v16  ;;  %v267_v3 = vmul.f32 %v245_v59, %v774_v17  ;;  %v268_v43 = vmul.f32 %v245_v59, %v776_v18 }
  0x8f   :  { %v257_v44 = vmul.f32 %v240_v60, %v770_v15  ;;  %v258_v45 = vmul.f32 %v240_v60, %v772_v16  ;;  %v265_v46 = vmul.f32 %v240_v60, %v774_v17  ;;  %v266_v47 = vmul.f32 %v240_v60, %v776_v18 }
  0x90   :  { %v275_v7 = vadd.f32 %v259_v63, %v187_v29  ;;  %v276_v8 = vadd.f32 %v260_v0, %v188_v30  ;;  %v283_v11 = vadd.f32 %v267_v3, %v195_v31  ;;  %v284_v12 = vadd.f32 %v268_v43, %v196_v32 }
  0x91   :  { %v255_v5 = vpop.permute.xlu1 %254  ;;  %v273_v33 = vadd.f32 %v257_v44, %v185_v25  ;;  %v274_v34 = vadd.f32 %v258_v45, %v186_v26  ;;  %v281_v35 = vadd.f32 %v265_v46, %v193_v27  ;;  %v282_v36 = vadd.f32 %v266_v47, %v194_v28 }
  0x92   :  { %v250_v6 = vpop.permute.xlu0 %249  ;;  %v263_v9 = vmul.f32 %v255_v5, %v770_v15  ;;  %v264_v10 = vmul.f32 %v255_v5, %v772_v16  ;;  %v271_v13 = vmul.f32 %v255_v5, %v774_v17  ;;  %v272_v14 = vmul.f32 %v255_v5, %v776_v18 }
  0x93   :  { %v261_v37 = vmul.f32 %v250_v6, %v770_v15  ;;  %v262_v38 = vmul.f32 %v250_v6, %v772_v16  ;;  %v269_v29 = vmul.f32 %v250_v6, %v774_v17  ;;  %v270_v30 = vmul.f32 %v250_v6, %v776_v18 }
  0x94   :  { %v279_v31 = vadd.f32 %v263_v9, %v191_v48  ;;  %v280_v32 = vadd.f32 %v264_v10, %v192_v49  ;;  %v804_v25 = vadd.f32 %v271_v13, %v199_v50  ;;  %v806_v26 = vadd.f32 %v272_v14, %v200_v4 }
  0x95   :  { %v333_v39 = vpop.permute.xlu1 %332  ;;  %v277_v41 = vadd.f32 %v261_v37, %v189_v61  ;;  %v278_v52 = vadd.f32 %v262_v38, %v190_v62  ;;  %v285_v53 = vadd.f32 %v269_v29, %v197_v1  ;;  %v286_v54 = vadd.f32 %v270_v30, %v198_v2 }
  0x96   :  { %v328_v40 = vpop.permute.xlu0 %327  ;;  %v347_v42 = vmul.f32 %v333_v39, %v778_v19  ;;  %v348_v51 = vmul.f32 %v333_v39, %v780_v20  ;;  %v355_v15 = vmul.f32 %v333_v39, %v782_v23  ;;  %v356_v16 = vmul.f32 %v333_v39, %v784_v24 }
  0x97   :  { %v345_v17 = vmul.f32 %v328_v40, %v778_v19  ;;  %v346_v18 = vmul.f32 %v328_v40, %v780_v20  ;;  %v353_v27 = vmul.f32 %v328_v40, %v782_v23  ;;  %v354_v28 = vmul.f32 %v328_v40, %v784_v24 }
  0x98   :  { %v363_v59 = vadd.f32 %v347_v42, %v275_v7  ;;  %v364_v60 = vadd.f32 %v348_v51, %v276_v8  ;;  %v371_v3 = vadd.f32 %v355_v15, %v283_v11  ;;  %v372_v43 = vadd.f32 %v356_v16, %v284_v12 }
  0x99   :  { %v343_v55 = vpop.permute.xlu1 %342  ;;  %v361_v44 = vadd.f32 %v345_v17, %v273_v33  ;;  %v362_v45 = vadd.f32 %v346_v18, %v274_v34  ;;  %v369_v61 = vadd.f32 %v353_v27, %v281_v35  ;;  %v370_v62 = vadd.f32 %v354_v28, %v282_v36 }
  0x9a   :  { %v338_v56 = vpop.permute.xlu0 %337  ;;  %v351_v57 = vmul.f32 %v343_v55, %v778_v19  ;;  %v352_v58 = vmul.f32 %v343_v55, %v780_v20  ;;  %v359_v39 = vmul.f32 %v343_v55, %v782_v23  ;;  %v360_v42 = vmul.f32 %v343_v55, %v784_v24 }
  0x9b   :  { %v349_v63 = vmul.f32 %v338_v56, %v778_v19  ;;  %v350_v0 = vmul.f32 %v338_v56, %v780_v20  ;;  %v357_v1 = vmul.f32 %v338_v56, %v782_v23  ;;  %v358_v2 = vmul.f32 %v338_v56, %v784_v24 }
  0x9c   :  { %v367_v48 = vadd.f32 %v351_v57, %v279_v31  ;;  %v368_v49 = vadd.f32 %v352_v58, %v280_v32  ;;  %v375_v23 = vadd.f32 %v359_v39, %v804_v25  ;;  %v460_v25 = vld [vmem:[%s850_s3 + $0x18] sm:$0xff]  ;;  %v613_v39 = vld [vmem:[%s851_s4] ss:$0 sm:$0xff] }
  0x9d   :  { %v389_v46 = vpop.permute.xlu1 %388  ;;  %v365_v6 = vadd.f32 %v349_v63, %v277_v41  ;;  %v366_v20 = vadd.f32 %v350_v0, %v278_v52  ;;  %v373_v32 = vadd.f32 %v357_v1, %v285_v53  ;;  %v374_v16 = vadd.f32 %v358_v2, %v286_v54 }
  0x9e   :  { %v384_v47 = vpop.permute.xlu0 %383  ;;  %v403_v50 = vadd.f32 %v389_v46, %v363_v59  ;;  %v404_v4 = vadd.f32 %v389_v46, %v364_v60  ;;  %v411_v35 = vadd.f32 %v389_v46, %v371_v3  ;;  %v412_v36 = vadd.f32 %v389_v46, %v372_v43 }
  0x9f   :  { %v401_v5 = vadd.f32 %v384_v47, %v361_v44  ;;  %v402_v19 = vadd.f32 %v384_v47, %v362_v45  ;;  %v409_v7 = vadd.f32 %v384_v47, %v369_v61  ;;  %v410_v8 = vadd.f32 %v384_v47, %v370_v62  ;;  %v458_v45 = vld [vmem:[%s850_s3 + $0x8] sm:$0xff]  ;;  %v457_v61 = vld [vmem:[%s850_s3] sm:$0xff] }
  0xa0   :  { %v419_v9 = vmax.f32 %v403_v50, 0.0  ;;  %v420_v10 = vmax.f32 %v404_v4, 0.0  ;;  %v427_v18 = vmax.f32 %v411_v35, 0.0  ;;  %v428_v27 = vmax.f32 %v412_v36, 0.0 }
  0xa1   :  { %v417_v11 = vmax.f32 %v401_v5, 0.0  ;;  %v418_v12 = vmax.f32 %v402_v19, 0.0  ;;  %v399_v13 = vpop.permute.xlu1 %398  ;;  %v425_v33 = vmax.f32 %v409_v7, 0.0  ;;  %v426_v34 = vmax.f32 %v410_v8, 0.0 }
  0xa2   :  { %v394_v14 = vpop.permute.xlu0 %393  ;;  %v436_v37 = vadd.f32 %v420_v10, %v419_v9  ;;  %v407_v40 = vadd.f32 %v399_v13, %v367_v48  ;;  %v408_v31 = vadd.f32 %v399_v13, %v368_v49  ;;  %v376_v53 = vadd.f32 %v360_v42, %v806_v26  ;;  %v459_v26 = vld [vmem:[%s850_s3 + $0x10] sm:$0xff] }
  0xa3   :  { %v433_v38 = vadd.f32 %v418_v12, %v417_v11  ;;  %v405_v29 = vadd.f32 %v394_v14, %v365_v6  ;;  %v406_v30 = vadd.f32 %v394_v14, %v366_v20  ;;  %v445_v17 = vadd.f32 %v426_v34, %v425_v33 }
  0xa4   :  { %437 = vadd.xlane.f32.xlu1 %v436_v37  ;;  %v413_v28 = vadd.f32 %v394_v14, %v373_v32  ;;  %v423_v52 = vmax.f32 %v407_v40, 0.0  ;;  %v424_v56 = vmax.f32 %v408_v31, 0.0  ;;  %v414_v57 = vadd.f32 %v394_v14, %v374_v16 }
  0xa5   :  { %434 = vadd.xlane.f32.xlu0 %v433_v38  ;;  %v421_v51 = vmax.f32 %v405_v29, 0.0  ;;  %v422_v15 = vmax.f32 %v406_v30, 0.0  ;;  %v448_v24 = vadd.f32 %v428_v27, %v427_v18  ;;  %v415_v55 = vadd.f32 %v399_v13, %v375_v23 }
  0xa6   :  { %v442_v58 = vadd.f32 %v424_v56, %v423_v52  ;;  %v429_v59 = vmax.f32 %v413_v28, 0.0  ;;  %v430_v60 = vmax.f32 %v414_v57, 0.0  ;;  %v416_v54 = vadd.f32 %v399_v13, %v376_v53 }
  0xa7   :  { %v439_v41 = vadd.f32 %v422_v15, %v421_v51  ;;  %v431_v0 = vmax.f32 %v415_v55, 0.0  ;;  %v660_v44 = vmov 0.0   ;;  %v477_v2 = vand.u32 127, %v41_v21 }
  0xa8   :  { %v451_v63 = vadd.f32 %v430_v60, %v429_v59  ;;  %v432_v3 = vmax.f32 %v416_v54, 0.0  ;;  %620 = vmatprep.subr.mxu0 %v660_v44  ;;  %628 = vmatprep.mubr.msk.f32.mxu0 %vm661_vm0, %v660_v44 }
  0xa9   :  { %440 = vadd.xlane.f32.xlu1 %v439_v41  ;;  %446 = vadd.xlane.f32.xlu0 %v445_v17  ;;  %v482_v47 = vadd.s32 4294967288, %v477_v2  ;;  %v489_v48 = vadd.s32 4294967280, %v477_v2  ;;  %v496_v50 = vadd.s32 4294967272, %v477_v2  ;;  %v480_v19 = vsub.s32 %v477_v2, %v754_v22 }
  0xaa   :  { %v454_v43 = vadd.f32 %v432_v3, %v431_v0  ;;  %621 = vmatpush3.msra.mxu0 %v460_v25 }
  0xab   :  { %622 = vmatprep.subr.mxu0 %v660_v44  ;;  %v485_v5 = vsub.s32 %v482_v47, %v754_v22  ;;  %v492_v6 = vsub.s32 %v489_v48, %v754_v22  ;;  %v499_v20 = vsub.s32 %v496_v50, %v754_v22 }
  0xac   :  { %623 = vmatpush3.msra.mxu0 %v459_v26 }
  0xad   :  { %443 = vadd.xlane.f32.xlu1 %v442_v58  ;;  %449 = vadd.xlane.f32.xlu0 %v448_v24 }
  0xae   :  { %624 = vmatprep.subr.mxu0 %v660_v44 }
  0xaf   :  { %625 = vmatpush3.msra.mxu0 %v458_v45 }
  0xb0   :  { %626 = vmatprep.subr.mxu0 %v660_v44 }
  0xb1   :  { %452 = vadd.xlane.f32.xlu0 %v451_v63  ;;  %627 = vmatpush3.msra.mxu0 %v457_v61 }
  0xb5   :  { %455 = vadd.xlane.f32.xlu0 %v454_v43 }
 0x12d   :  { %v438_v62 = vpop.xlane.xlu1 %437 }
 0x12e   :  { %v435_v1 = vpop.xlane.xlu0 %434  ;;  %v486_v9 = vrot.slane %v438_v62, %v485_v5 }
 0x12f   :  { %v481_v10 = vrot.slane %v435_v1, %v480_v19 }
 0x131   :  { %v488_v34 = vsel %vm487_vm1, %v486_v9, %v481_v10 }
 0x132   :  { %v447_v46 = vpop.xlane.xlu0 %446  ;;  %v441_v49 = vpop.xlane.xlu1 %440 }
 0x133   :  { %v493_v21 = vrot.slane %v441_v49, %v492_v6  ;;  %v506_v13 = vrot.slane %v447_v46, %v480_v19 }
 0x135   :  { %v495_v37 = vsel %vm494_vm2, %v493_v21, %v488_v34 }
 0x136   :  { %v450_v4 = vpop.xlane.xlu0 %449  ;;  %v444_v7 = vpop.xlane.xlu1 %443 }
 0x137   :  { %v510_v11 = vrot.slane %v450_v4, %v485_v5  ;;  %v500_v14 = vrot.slane %v444_v7, %v499_v20 }
 0x139   :  { %v511_v35 = vsel %vm487_vm1, %v510_v11, %v506_v13  ;;  %v502_v22 = vsel %vm501_vm3, %v500_v14, %v495_v37 }
 0x13a   :  { %v453_v8 = vpop.xlane.xlu0 %452 }
 0x13b   :  { %v515_v12 = vrot.slane %v453_v8, %v492_v6 }
 0x13d   :  { %v516_v38 = vsel %vm494_vm2, %v515_v12, %v511_v35 }
 0x13e   :  { %v456_v33 = vpop.xlane.xlu0 %455 }
 0x13f   :  { %v520_v36 = vrot.slane %v456_v33, %v499_v20 }
 0x141   :  { %v521_v29 = vsel %vm501_vm3, %v520_v36, %v516_v38 }
 0x142   :  { %v523_v30 = vsel %vm522_vm4, %v521_v29, %v502_v22 }
 0x143   :  { %629 = vmatmul.mubr.msk.f32.vlgmr.msra.gmra.mxu0 %vm524_vm5, %v523_v30 }
 0x203   :  { %v593_v40 = vpop.f32.mrf.mxu0 }
 0x204   :  { %v594_v31 = vadd.f32 %v613_v39, %v593_v40 }
 0x205   :  { %v630_v32 = vpop.f32.mrf.mxu0 }
 0x206   :  { %598 = vst.msk [vmem:[#allocation2] sm:$0x3] %vm597_vm6, %v594_v31 }
 0x207   :  { %648 = shalt.err (!%p645_p4)
}
 0x208   :  { %608 = dma.vmem_to_hbm [thread:$0]  %s606_s19, 32, %s852_s5, [#allocation3]  }
 0x209   :  { %657 = dma.done.wait [#allocation3], 32  }
 0x20a   :  { %658 = vsyncadd [#allocation3], 4294967264 }
 0x20b   :  { %612 = vsyncpa [#allocation3], 1 }

</bundles_post_ra>
